<compile_context>
chip_gen: v5e
topology: v5e:2x2
jax: 0.10.0
libtpu: 0.0.40
codegen_flags: <defaults>
</compile_context>

<pallas_src>
import functools

import jax
import jax.numpy as jnp
from jax.experimental import pallas as pl
from jax.experimental.pallas import tpu as pltpu

BN_EPS = 1e-5
DEFAULT_BLOCK_B = 8192  # rows per batch tile (multiple of 256)


def _round_up(n, m):
    return (n + m - 1) // m * m


def _choose_tb(batch, block_b):
    """Pick the batch-tile size (rows)."""
    block_b = max(256, _round_up(block_b, 256))
    if batch <= 256:
        return _round_up(max(batch, 8), 8)          # single small tile
    if batch >= 1024:
        # v7x has 2 TensorCores: guarantee >= 2 tiles so the "parallel"
        # batch axis actually shards across both cores.
        cap = _round_up((batch + 1) // 2, 256)
    else:
        cap = _round_up(batch, 256)
    return min(block_b, cap)


def _stats_kernel(x_ref, w1_ref, b1_ref, w2_ref, b2_ref,
                  h2_ref, sum_ref, sumsq_ref, *, tile_b, batch):
    """Pass 1: Linear1->ReLU->Linear2, stash h2, emit masked partial sums."""
    x = x_ref[...]                                                   # (TB, nin) bf16
    h1 = jnp.dot(x, w1_ref[...], preferred_element_type=jnp.float32) + b1_ref[...]
    h1 = jnp.maximum(h1, 0.0)
    h2 = jnp.dot(h1.astype(w2_ref.dtype), w2_ref[...],
                 preferred_element_type=jnp.float32) + b2_ref[...]   # (TB, d2) f32
    h2_ref[...] = h2                                                 # stash for pass 2

    # Mask rows that are batch padding (only the last tile can have them);
    # padded x rows are zeros, so h2 there is finite and 0*h2 is safe.
    row0 = pl.program_id(0) * tile_b
    rows = row0 + jax.lax.broadcasted_iota(jnp.int32, (tile_b, 1), 0)
    valid = (rows < batch).astype(jnp.float32)
    h2m = h2 * valid
    sum_ref[0] = jnp.sum(h2m, axis=0, keepdims=True)                 # (1, d2)
    sumsq_ref[0] = jnp.sum(h2m * h2m, axis=0, keepdims=True)         # (1, d2)


def _head_kernel(h2_ref, g2_ref, be2_ref, mean_ref, rstd_ref, w3_ref, b3_ref,
                 o_ref):
    """Pass 2: BN(global stats) -> ReLU -> Linear3 -> sigmoid."""
    h2 = h2_ref[...]                                                 # (TB, d2) f32
    h2 = g2_ref[...] * (h2 - mean_ref[...]) * rstd_ref[...] + be2_ref[...]
    h2 = jnp.maximum(h2, 0.0)
    logits = jnp.dot(h2.astype(w3_ref.dtype), w3_ref[...],
                     preferred_element_type=jnp.float32) + b3_ref[...]
    o_ref[...] = jax.nn.sigmoid(logits)                              # (TB, nout)


def mlp_classify(x, params, *, block_b=DEFAULT_BLOCK_B):
    w1, b1, w2, b2, g2, be2, w3, b3 = params
    B, nin = x.shape
    d1 = w1.shape[1]
    d2 = w2.shape[1]
    nout = w3.shape[1]

    # bf16 storage in HBM; skip the cast sweep if the caller already did it.
    if x.dtype != jnp.bfloat16:
        x = x.astype(jnp.bfloat16)

    tb = _choose_tb(B, block_b)
    b_pad = _round_up(B, tb)
    n_tiles = b_pad // tb
    if b_pad != B:
        x = jnp.pad(x, ((0, b_pad - B), (0, 0)))

    cparams = pltpu.CompilerParams(
        dimension_semantics=("parallel",),
        vmem_limit_bytes=32 * 1024 * 1024,
    )

    def resident(shape):
        return pl.BlockSpec(shape, lambda i: (0,) * len(shape))

    # ---- Pass 1: hidden forward, h2 stash + partial BN statistics. ----
    h2_stash, part_sum, part_sq = pl.pallas_call(
        functools.partial(_stats_kernel, tile_b=tb, batch=B),
        grid=(n_tiles,),
        in_specs=[
            pl.BlockSpec((tb, nin), lambda i: (i, 0)),
            resident((nin, d1)), resident((1, d1)),
            resident((d1, d2)), resident((1, d2)),
        ],
        out_specs=[
            pl.BlockSpec((tb, d2), lambda i: (i, 0)),
            pl.BlockSpec((1, 1, d2), lambda i: (i, 0, 0)),
            pl.BlockSpec((1, 1, d2), lambda i: (i, 0, 0)),
        ],
        out_shape=[
            jax.ShapeDtypeStruct((b_pad, d2), jnp.float32),
            jax.ShapeDtypeStruct((n_tiles, 1, d2), jnp.float32),
            jax.ShapeDtypeStruct((n_tiles, 1, d2), jnp.float32),
        ],
        compiler_params=cparams,
    )(x, w1, b1, w2, b2)

    # Tiny XLA reduction: global mean / biased var (training-mode BN).
    s1 = jnp.sum(part_sum, axis=0)                      # (1, d2)
    s2 = jnp.sum(part_sq, axis=0)                       # (1, d2)
    mean = s1 / B
    var = jnp.maximum(s2 / B - mean * mean, 0.0)        # guard tiny cancellation
    rstd = jax.lax.rsqrt(var + BN_EPS)

    # ---- Pass 2: BN + ReLU + Linear3 + sigmoid on the stashed h2. ----
    out = pl.pallas_call(
        _head_kernel,
        grid=(n_tiles,),
        in_specs=[
            pl.BlockSpec((tb, d2), lambda i: (i, 0)),
            resident((1, d2)), resident((1, d2)),       # gamma, beta
            resident((1, d2)), resident((1, d2)),       # mean, rstd
            resident((d2, nout)), resident((1, nout)),  # w3, b3
        ],
        out_specs=pl.BlockSpec((tb, nout), lambda i: (i, 0)),
        out_shape=jax.ShapeDtypeStruct((b_pad, nout), jnp.float32),
        compiler_params=cparams,
    )(h2_stash, g2, be2, mean, rstd, w3, b3)

    return out[:B]                                      # (B, nout)


def init_params(key, ninput, hidden, noutput, init_std=0.02):
    # Mirrors MLP_Classify.init_weights: weights ~ N(0, 0.02), biases = 0,
    # BN gamma also hit by the try/except -> N(0, 0.02), BN beta = 0.
    h1, h2 = hidden
    ks = jax.random.split(key, 4)
    w1 = (init_std * jax.random.normal(ks[0], (ninput, h1), jnp.float32)).astype(jnp.bfloat16)
    b1 = jnp.zeros((1, h1), jnp.float32)
    w2 = (init_std * jax.random.normal(ks[1], (h1, h2), jnp.float32)).astype(jnp.bfloat16)
    b2 = jnp.zeros((1, h2), jnp.float32)
    g2 = init_std * jax.random.normal(ks[2], (1, h2), jnp.float32)
    be2 = jnp.zeros((1, h2), jnp.float32)
    w3 = (init_std * jax.random.normal(ks[3], (h2, noutput), jnp.float32)).astype(jnp.bfloat16)
    b3 = jnp.zeros((1, noutput), jnp.float32)
    return (w1, b1, w2, b2, g2, be2, w3, b3)


def mlp_classify_ref(x, params):
    """Pure-JAX reference (f32 math, same bf16 parameter values)."""
    w1, b1, w2, b2, g2, be2, w3, b3 = params
    xf = x.astype(jnp.float32)
    h1 = jnp.maximum(xf @ w1.astype(jnp.float32) + b1, 0.0)
    h2 = h1 @ w2.astype(jnp.float32) + b2
    mean = jnp.mean(h2, axis=0, keepdims=True)
    var = jnp.mean(h2 * h2, axis=0, keepdims=True) - mean * mean   # biased var
    h2 = g2 * (h2 - mean) * jax.lax.rsqrt(var + BN_EPS) + be2
    h2 = jnp.maximum(h2, 0.0)
    logits = h2 @ w3.astype(jnp.float32) + b3
    return jax.nn.sigmoid(logits)


if __name__ == "__main__":
    ninput, hidden, noutput = 32, (64, 32), 1   # layers = "64-32"

    key = jax.random.PRNGKey(0)
    kp, kx1, kx2 = jax.random.split(key, 3)
    params = init_params(kp, ninput, hidden, noutput)

    # Small module-scale smoke test (single tile, no padding).
    x_small = jax.random.normal(kx1, (8, ninput), jnp.float32).astype(jnp.bfloat16)
    out_small = jax.block_until_ready(mlp_classify(x_small, params))
    assert out_small.shape == (8, noutput)
    assert bool(jnp.max(jnp.abs(out_small - mlp_classify_ref(x_small, params))) < 5e-3)

    # Multi-tile test: exercises batch tiling, padding + stat masking,
    # VMEM-resident weights, and the h2 stash between passes.
    x_big = jax.random.normal(kx2, (1000, ninput), jnp.float32).astype(jnp.bfloat16)
    out_big = jax.block_until_ready(mlp_classify(x_big, params, block_b=256))
    assert out_big.shape == (1000, noutput)
    assert bool(jnp.all(jnp.isfinite(out_big)))
    assert bool(jnp.max(jnp.abs(out_big - mlp_classify_ref(x_big, params))) < 5e-3)

    # Default (large) tile path.
    out_def = jax.block_until_ready(mlp_classify(x_big, params))
    assert bool(jnp.max(jnp.abs(out_def - mlp_classify_ref(x_big, params))) < 5e-3)

    print("KERNEL_OK")
</pallas_src>

<mosaic_0001>
module attributes {stable_mosaic.version = 11 : i64} {
  func.func @_stats_kernel(%arg0: i32, %arg1: memref<8x32xbf16, #tpu.memory_space<vmem>>, %arg2: memref<32x64xbf16, #tpu.memory_space<vmem>>, %arg3: memref<1x64xf32, #tpu.memory_space<vmem>>, %arg4: memref<64x32xbf16, #tpu.memory_space<vmem>>, %arg5: memref<1x32xf32, #tpu.memory_space<vmem>>, %arg6: memref<8x32xf32, #tpu.memory_space<vmem>>, %arg7: memref<1x1x32xf32, #tpu.memory_space<vmem>>, %arg8: memref<1x1x32xf32, #tpu.memory_space<vmem>>) attributes {dimension_semantics = [#tpu.dimension_semantics<parallel>], iteration_bounds = array<i64: 1>, scalar_prefetch = 0 : i64, scratch_operands = 0 : i64, tpu.core_type = #tpu.core_type<tc>, window_params = [{transform_indices = @transform_0, window_bounds = array<i64: 8, 32>}, {pipeline_mode = #tpu.pipeline_mode<synchronous>, transform_indices = @transform_1, window_bounds = array<i64: 32, 64>}, {pipeline_mode = #tpu.pipeline_mode<synchronous>, transform_indices = @transform_2, window_bounds = array<i64: 1, 64>}, {pipeline_mode = #tpu.pipeline_mode<synchronous>, transform_indices = @transform_3, window_bounds = array<i64: 64, 32>}, {pipeline_mode = #tpu.pipeline_mode<synchronous>, transform_indices = @transform_4, window_bounds = array<i64: 1, 32>}, {transform_indices = @transform_5, window_bounds = array<i64: 8, 32>}, {transform_indices = @transform_6, window_bounds = array<i64: 1, 1, 32>}, {transform_indices = @transform_7, window_bounds = array<i64: 1, 1, 32>}]} {
    %c0 = arith.constant 0 : index
    %c0_0 = arith.constant 0 : index
    %0 = vector.load %arg1[%c0, %c0_0] : memref<8x32xbf16, #tpu.memory_space<vmem>>, vector<8x32xbf16>
    %c0_1 = arith.constant 0 : index
    %c0_2 = arith.constant 0 : index
    %1 = vector.load %arg2[%c0_1, %c0_2] : memref<32x64xbf16, #tpu.memory_space<vmem>>, vector<32x64xbf16>
    %cst = arith.constant dense<0.000000e+00> : vector<8x64xf32>
    %2 = tpu.matmul %0, %1, %cst {dimension_numbers = #tpu.dot_dimension_numbers<[1], [0], [0], [1], [0, 0, 1, 1], [], []>} : vector<8x32xbf16>, vector<32x64xbf16>, vector<8x64xf32> -> vector<8x64xf32>
    %c0_3 = arith.constant 0 : index
    %c0_4 = arith.constant 0 : index
    %3 = vector.load %arg3[%c0_3, %c0_4] : memref<1x64xf32, #tpu.memory_space<vmem>>, vector<1x64xf32>
    %4 = vector.broadcast %3 : vector<1x64xf32> to vector<8x64xf32>
    %5 = arith.addf %2, %4 : vector<8x64xf32>
    %cst_5 = arith.constant 0.000000e+00 : f32
    %6 = vector.broadcast %cst_5 : f32 to vector<8x64xf32>
    %7 = arith.maximumf %5, %6 : vector<8x64xf32>
    %8 = arith.truncf %7 : vector<8x64xf32> to vector<8x64xbf16>
    %c0_6 = arith.constant 0 : index
    %c0_7 = arith.constant 0 : index
    %9 = vector.load %arg4[%c0_6, %c0_7] : memref<64x32xbf16, #tpu.memory_space<vmem>>, vector<64x32xbf16>
    %cst_8 = arith.constant dense<0.000000e+00> : vector<8x32xf32>
    %10 = tpu.matmul %8, %9, %cst_8 {dimension_numbers = #tpu.dot_dimension_numbers<[1], [0], [0], [1], [0, 0, 1, 1], [], []>} : vector<8x64xbf16>, vector<64x32xbf16>, vector<8x32xf32> -> vector<8x32xf32>
    %c0_9 = arith.constant 0 : index
    %c0_10 = arith.constant 0 : index
    %11 = vector.load %arg5[%c0_9, %c0_10] : memref<1x32xf32, #tpu.memory_space<vmem>>, vector<1x32xf32>
    %12 = vector.broadcast %11 : vector<1x32xf32> to vector<8x32xf32>
    %13 = arith.addf %10, %12 : vector<8x32xf32>
    %c0_11 = arith.constant 0 : index
    %c0_12 = arith.constant 0 : index
    %14 = vector.load %arg6[%c0_11, %c0_12] : memref<8x32xf32, #tpu.memory_space<vmem>>, vector<8x32xf32>
    tpu.vector_store %arg6[%c0_11, %c0_12], %13 {strides = array<i32>} : memref<8x32xf32, #tpu.memory_space<vmem>>, vector<8x32xf32>,
    %c8_i32 = arith.constant 8 : i32
    %15 = arith.muli %arg0, %c8_i32 : i32
    %16 = tpu.iota {dimensions = array<i32: 0>} : vector<8x1xi32>
    %17 = vector.broadcast %15 : i32 to vector<8x1xi32>
    %18 = arith.addi %17, %16 : vector<8x1xi32>
    %c8_i32_13 = arith.constant 8 : i32
    %19 = vector.broadcast %c8_i32_13 : i32 to vector<8x1xi32>
    %20 = arith.cmpi slt, %18, %19 : vector<8x1xi32>
    %21 = arith.extui %20 : vector<8x1xi1> to vector<8x1xi32>
    %22 = arith.sitofp %21 : vector<8x1xi32> to vector<8x1xf32>
    %23 = vector.broadcast %22 : vector<8x1xf32> to vector<8x32xf32>
    %24 = arith.mulf %13, %23 : vector<8x32xf32>
    %cst_14 = arith.constant dense<0.000000e+00> : vector<32xf32>
    %25 = vector.multi_reduction <add>, %24, %cst_14 [0] : vector<8x32xf32> to vector<32xf32>
    %26 = vector.shape_cast %25 : vector<32xf32> to vector<1x32xf32>
    %c0_15 = arith.constant 0 : index
    %c0_16 = arith.constant 0 : index
    %c0_17 = arith.constant 0 : index
    %27 = vector.load %arg7[%c0_15, %c0_16, %c0_17] : memref<1x1x32xf32, #tpu.memory_space<vmem>>, vector<1x1x32xf32>
    %28 = vector.shape_cast %27 : vector<1x1x32xf32> to vector<1x32xf32>
    %29 = vector.shape_cast %26 : vector<1x32xf32> to vector<1x1x32xf32>
    tpu.vector_store %arg7[%c0_15, %c0_16, %c0_17], %29 {strides = array<i32>} : memref<1x1x32xf32, #tpu.memory_space<vmem>>, vector<1x1x32xf32>,
    %30 = arith.mulf %24, %24 : vector<8x32xf32>
    %cst_18 = arith.constant dense<0.000000e+00> : vector<32xf32>
    %31 = vector.multi_reduction <add>, %30, %cst_18 [0] : vector<8x32xf32> to vector<32xf32>
    %32 = vector.shape_cast %31 : vector<32xf32> to vector<1x32xf32>
    %c0_19 = arith.constant 0 : index
    %c0_20 = arith.constant 0 : index
    %c0_21 = arith.constant 0 : index
    %33 = vector.load %arg8[%c0_19, %c0_20, %c0_21] : memref<1x1x32xf32, #tpu.memory_space<vmem>>, vector<1x1x32xf32>
    %34 = vector.shape_cast %33 : vector<1x1x32xf32> to vector<1x32xf32>
    %35 = vector.shape_cast %32 : vector<1x32xf32> to vector<1x1x32xf32>
    tpu.vector_store %arg8[%c0_19, %c0_20, %c0_21], %35 {strides = array<i32>} : memref<1x1x32xf32, #tpu.memory_space<vmem>>, vector<1x1x32xf32>,
    return
  }
  func.func @transform_0(%arg0: i32) -> (i32, i32) {
    %c0_i32 = arith.constant 0 : i32
    %c0_i32_0 = arith.constant 0 : i32
    return %arg0, %c0_i32 : i32, i32
  }
  func.func @transform_1(%arg0: i32) -> (i32, i32) {
    %c0_i32 = arith.constant 0 : i32
    %c0_i32_0 = arith.constant 0 : i32
    %c0_i32_1 = arith.constant 0 : i32
    return %c0_i32, %c0_i32_0 : i32, i32
  }
  func.func @transform_2(%arg0: i32) -> (i32, i32) {
    %c0_i32 = arith.constant 0 : i32
    %c0_i32_0 = arith.constant 0 : i32
    %c0_i32_1 = arith.constant 0 : i32
    return %c0_i32, %c0_i32_0 : i32, i32
  }
  func.func @transform_3(%arg0: i32) -> (i32, i32) {
    %c0_i32 = arith.constant 0 : i32
    %c0_i32_0 = arith.constant 0 : i32
    %c0_i32_1 = arith.constant 0 : i32
    return %c0_i32, %c0_i32_0 : i32, i32
  }
  func.func @transform_4(%arg0: i32) -> (i32, i32) {
    %c0_i32 = arith.constant 0 : i32
    %c0_i32_0 = arith.constant 0 : i32
    %c0_i32_1 = arith.constant 0 : i32
    return %c0_i32, %c0_i32_0 : i32, i32
  }
  func.func @transform_5(%arg0: i32) -> (i32, i32) {
    %c0_i32 = arith.constant 0 : i32
    %c0_i32_0 = arith.constant 0 : i32
    return %arg0, %c0_i32 : i32, i32
  }
  func.func @transform_6(%arg0: i32) -> (i32, i32, i32) {
    %c0_i32 = arith.constant 0 : i32
    %c0_i32_0 = arith.constant 0 : i32
    %c0_i32_1 = arith.constant 0 : i32
    return %arg0, %c0_i32, %c0_i32_0 : i32, i32, i32
  }
  func.func @transform_7(%arg0: i32) -> (i32, i32, i32) {
    %c0_i32 = arith.constant 0 : i32
    %c0_i32_0 = arith.constant 0 : i32
    %c0_i32_1 = arith.constant 0 : i32
    return %arg0, %c0_i32, %c0_i32_0 : i32, i32, i32
  }
}

</mosaic_0001>

<bundles_post_ra>
// kernel: tpu_custom_call.1
= control target key start
LH: loop header
LB: loop body
LE: loop exit
PB: predicated region body
PF: predicated region fallthrough
CT: control target
= control target key end

     0   :  { %13 = vsyncpa [#allocation3], 0  ;;  %s390_s0 = inlined_call_operand.vmem [shape: bf16[8,32], index: 0, kind: input, shape index: {}]   ;;  %s391_s1 = inlined_call_operand.vmem [shape: bf16[32,64], index: 1, kind: input, shape index: {}]   ;;  %s392_s2 = inlined_call_operand.vmem [shape: f32[1,64], index: 2, kind: input, shape index: {}]   ;;  %s393_s3 = inlined_call_operand.vmem [shape: bf16[64,32], index: 3, kind: input, shape index: {}]   ;;  %s394_s4 = inlined_call_operand.vmem [shape: f32[1,32], index: 4, kind: input, shape index: {}]   ;;  %s395_s5 = inlined_call_operand.hbm [shape: f32[8,32], index: 5, kind: output, shape index: {0}]   ;;  %s396_s6 = inlined_call_operand.hbm [shape: f32[1,1,32], index: 6, kind: output, shape index: {1}]   ;;  %s397_s7 = inlined_call_operand.hbm [shape: f32[1,1,32], index: 7, kind: output, shape index: {2}]  }
   0x1   :  { %v221_v0 = vld [vmem:[%s391_s1 + $0x8] sm:$0xff]  ;;  %v225_v1 = vld [vmem:[%s393_s3 + $0x18] sm:$0xff]  ;;  %v220_v2 = vld [vmem:[%s391_s1] sm:$0xff] }
   0x2   :  { %57 = vmatpush.bf16.msra.mxu0 %v221_v0 }
   0x3   :  { %14 = vsyncpa [#allocation5], 0  ;;  %110 = vmatpush.bf16.msra.mxu1 %v225_v1  ;;  %v224_v3 = vld [vmem:[%s393_s3 + $0x10] sm:$0xff]  ;;  %v26_v4 = vld [vmem:[%s390_s0] sm:$0xf]  ;;  %vm47_vm0 = vcmask 261120  }
   0x4   :  { %v223_v5 = vld [vmem:[%s393_s3 + $0x8] sm:$0xff]  ;;  %v222_v6 = vld [vmem:[%s393_s3] sm:$0xff]  ;;  %vm102_vm1 = vcmask 523264   ;;  %s307_s17 = smov [#allocation2]   ;;  %s154_s20 = sshll.u32 %s395_s5, 4  ;;  %vm136_vm2 = vcmask 253952   ;;  %s155_s20 = int_to_ptr.hbm [resolvable:$true] %s154_s20 }
   0x5   :  { %v229_v7 = vld [vmem:[%s392_s2] ss:$0 sm:$0xff]  ;;  %s152_s18 = sshll.u32 %s307_s17, 4  ;;  %s308_s2 = smov [#allocation4]   ;;  %s153_s18 = int_to_ptr.vmem [resolvable:$true] %s152_s18 }
   0x6   :  { %58 = vmatpush.bf16.msra.mxu0 %v220_v2  ;;  %v230_v13 = vld [vmem:[%s394_s4] ss:$0 sm:$0xff]  ;;  %s163_s4 = sshll.u32 %s308_s2, 4  ;;  %s165_s22 = sshll.u32 %s396_s6, 4  ;;  %s164_s4 = int_to_ptr.vmem [resolvable:$true] %s163_s4  ;;  %s166_s22 = int_to_ptr.hbm [resolvable:$true] %s165_s22 }
   0x7   :  { %111 = vmatpush.bf16.msra.mxu1 %v224_v3  ;;  %s309_s23 = smov [#allocation6]   ;;  %s176_s27 = sshll.u32 %s397_s7, 4  ;;  %s177_s27 = int_to_ptr.hbm [resolvable:$true] %s176_s27 }
   0x8   :  { %s174_s24 = sshll.u32 %s309_s23, 4  ;;  %s175_s24 = int_to_ptr.vmem [resolvable:$true] %s174_s24 }
   0x9   :  { %202 = vmatmul.msk.bf16.vlgmr.msra.gmra.mxu0 %vm47_vm0, %v26_v4 }
   0xb   :  { %112 = vmatpush.bf16.msra.mxu1 %v223_v5 }
   0xf   :  { %113 = vmatpush.bf16.msra.mxu1 %v222_v6 }
  0x86   :  { %v60_v8 = vpop.f32.mrf.mxu0 }
  0x87   :  { %v61_v9 = vadd.f32 %v229_v7, %v60_v8 }
  0x89   :  { %v64_v10 = vmax.f32 %v61_v9, 0.0 }
  0x8b   :  { %v65_v11 = vpack.c.bf16 %v64_v10, %v64_v10 }
  0x8d   :  { %219 = vmatmul.msk.bf16.vlgmr.msra.gmra.mxu1 %vm102_vm1, %v65_v11 }
  0x8e   :  { %v62_v12 = vpop.f32.mrf.mxu0 }
 0x10a   :  { %v115_v14 = vpop.f32.mrf.mxu1 }
 0x10b   :  { %v116_v15 = vadd.f32 %v230_v13, %v115_v14 }
 0x10d   :  { %v129_v16 = vsel %vm47_vm0, %v116_v15, 0.0  ;;  %v138_v17 = vmul.f32 %v116_v15, %v116_v15  ;;  %119 = vst.msk [vmem:[#allocation2] sm:$0xff] %vm47_vm0, %v116_v15 }
 0x10e   :  { %v130_v18 = vrot.slane %v129_v16, 4  ;;  %157 = dma.vmem_to_hbm [thread:$0]  %s153_s18, 128, %s155_s20, [#allocation3]  }
 0x10f   :  { %v139_v19 = vsel %vm47_vm0, %v138_v17, 0.0 }
 0x110   :  { %v131_v20 = vadd.f32 %v130_v18, %v129_v16  ;;  %v140_v21 = vrot.slane %v139_v19, 4 }
 0x112   :  { %v132_v22 = vrot.slane %v131_v20, 2  ;;  %v141_v23 = vadd.f32 %v140_v21, %v139_v19  ;;  %v117_v24 = vpop.f32.mrf.mxu1 }
 0x114   :  { %v133_v25 = vadd.f32 %v132_v22, %v131_v20  ;;  %v142_v26 = vrot.slane %v141_v23, 2 }
 0x116   :  { %v134_v27 = vrot.slane %v133_v25, 1  ;;  %v143_v28 = vadd.f32 %v142_v26, %v141_v23 }
 0x118   :  { %v135_v29 = vadd.f32 %v134_v27, %v133_v25  ;;  %v144_v30 = vrot.slane %v143_v28, 1 }
 0x11a   :  { %137 = vst.msk [vmem:[#allocation4] sm:$0x1] %vm136_vm2, %v135_v29  ;;  %v145_v31 = vadd.f32 %v144_v30, %v143_v28 }
 0x11b   :  { %168 = dma.vmem_to_hbm [thread:$0]  %s164_s4, 16, %s166_s22, [#allocation5]  }
 0x11c   :  { %146 = vst.msk [vmem:[#allocation6] sm:$0x1] %vm136_vm2, %v145_v31 }
 0x11d   :  { %179 = dma.vmem_to_hbm [thread:$0]  %s175_s24, 16, %s177_s27, [#allocation5]  }
 0x11e   :  { %303 = dma.done.wait [#allocation3], 128  }
 0x11f   :  { %304 = vsyncadd [#allocation3], 4294967168 }
 0x120   :  { %305 = dma.done.wait [#allocation5], 32  }
 0x121   :  { %306 = vsyncadd [#allocation5], 4294967264 }
 0x122   :  { %192 = vsyncpa [#allocation3], 1 }
 0x123   :  { %193 = vsyncpa [#allocation5], 1 }

</bundles_post_ra>
